<compile_context>
chip_gen: v5e
topology: v5e:2x2
jax: 0.10.0
libtpu: 0.0.40
codegen_flags: <defaults>
</compile_context>

<pallas_src>
import functools

import jax
import jax.numpy as jnp
from jax.experimental import pallas as pl
from jax.experimental.pallas import tpu as pltpu


# ----------------------------- Pallas kernels -------------------------------

def _grover_single_step_kernel(u_ref, y_ref, loss_ref, err_ref,
                               *, big_n, log2_n, inv_big_n):
    """Whole problem in one gridless call (D <= ~4096).

    u_ref : (2N, D) packed needed rows of U^T (rows 0..N-1 = Re, N..2N-1 = Im).
    y_ref : (2, D)  output state (row 0 = Re y, row 1 = Im y).
    loss_ref, err_ref : (1, 1) scalar outputs.
    """
    yr = jnp.sum(u_ref[:big_n, :], axis=0, keepdims=True)      # (1, D)
    yi = jnp.sum(u_ref[big_n:, :], axis=0, keepdims=True)      # (1, D)
    y_ref[0:1, :] = yr
    y_ref[1:2, :] = yi

    # Diagonal of the (N, N)-reshaped y: flat index c is on the diagonal iff
    # (c >> n) == (c & (N - 1)).
    col = jax.lax.broadcasted_iota(jnp.int32, yr.shape, 1)
    on_diag = (col >> log2_n) == (col & (big_n - 1))
    abs2 = yr * yr + yi * yi
    prob_sum = jnp.sum(jnp.where(on_diag, abs2, 0.0), axis=1, keepdims=True)
    min_abs2 = jnp.min(jnp.where(on_diag, abs2, jnp.inf), axis=1, keepdims=True)
    loss_ref[...] = 1.0 - prob_sum * inv_big_n          # 1 - prob_sum / 2^n
    err_ref[...] = 1.0 - min_abs2                        # 1 - min |diag|^2


def _grover_tiled_kernel(u_ref, y_ref, *, big_n):
    """One independent lane tile of y (no cross-grid state)."""
    yr = jnp.sum(u_ref[:big_n, :], axis=0, keepdims=True)
    yi = jnp.sum(u_ref[big_n:, :], axis=0, keepdims=True)
    y_ref[0:1, :] = yr
    y_ref[1:2, :] = yi


# --------------------------------- wrapper ----------------------------------

@functools.partial(jax.jit, static_argnames=("num_qubit", "lane_tile"))
def grover_query_forward(packed_rows, *, num_qubit, lane_tile=None):
    """packed_rows: (2N, D) float32, D = 4^num_qubit, rows 0..N-1 = Re U^T[i*N, :]
    and rows N..2N-1 = Im U^T[i*N, :] (the only rows the fixed initial state
    touches).  Returns (loss, error_rate, y) with y of shape (2, D) = (Re, Im)."""
    big_n = 2 ** num_qubit
    d = big_n * big_n
    assert packed_rows.shape == (2 * big_n, d), packed_rows.shape
    assert packed_rows.dtype == jnp.float32
    # TODO(synk): num_qubit < 4 gives D < 256 lanes; pad or fall back if needed.
    assert num_qubit >= 4, "lane layout assumes D = 4^num_qubit >= 256"

    if lane_tile is None:
        # Single gridless step for the shipped sizes; otherwise cap lane tiles at
        # 4096 so double-buffered blocks fit v7x's 64 MiB VMEM as well as v5e/v6e.
        lane_tile = d if d <= 4096 else 4096

    if lane_tile == d:
        # -------- single-step path: no grid, no pipeline/accumulator phases ----
        kernel = functools.partial(
            _grover_single_step_kernel, big_n=big_n, log2_n=num_qubit,
            inv_big_n=1.0 / big_n)
        y, loss, err = pl.pallas_call(
            kernel,
            out_shape=(
                jax.ShapeDtypeStruct((2, d), jnp.float32),    # y (Re, Im)
                jax.ShapeDtypeStruct((1, 1), jnp.float32),    # loss
                jax.ShapeDtypeStruct((1, 1), jnp.float32),    # error_rate
            ),
        )(packed_rows)
        return loss[0, 0], err[0, 0], y

    # -------- tiled path for large D ---------------------------------------
    assert d % lane_tile == 0 and lane_tile % 128 == 0
    kernel = functools.partial(_grover_tiled_kernel, big_n=big_n)
    y = pl.pallas_call(
        kernel,
        out_shape=jax.ShapeDtypeStruct((2, d), jnp.float32),
        grid_spec=pltpu.PrefetchScalarGridSpec(
            num_scalar_prefetch=0,
            grid=(d // lane_tile,),
            in_specs=[pl.BlockSpec((2 * big_n, lane_tile), lambda j: (0, j))],
            out_specs=pl.BlockSpec((2, lane_tile), lambda j: (0, j)),
        ),
        # Tiles are fully independent (no resident accumulator), so the grid axis
        # is "parallel" — both v7x TensorCores can stream halves of the read.
        # Raise the scoped VMEM limit so v5e's 16 MiB default is never binding.
        compiler_params=pltpu.CompilerParams(
            dimension_semantics=("parallel",),
            vmem_limit_bytes=48 << 20),
    )(packed_rows)

    # Trivial follow-up reduce over the N diagonal entries (plain XLA, ~N elems).
    diag_r = jnp.diagonal(y[0].reshape(big_n, big_n))
    diag_i = jnp.diagonal(y[1].reshape(big_n, big_n))
    abs2 = diag_r * diag_r + diag_i * diag_i
    loss = 1.0 - jnp.sum(abs2) / big_n
    err = 1.0 - jnp.min(abs2)
    return loss, err, y


# ----------------------- one-time parameter layout prep ----------------------

def pack_circuit_rows(U, num_qubit):
    """One-time setup (outside the per-call forward): the fixed initial state has
    its N ones at flat positions i*N, so the forward only ever needs columns i*N
    of U (= rows i*N of U^T).  Gather them once and pack the real and imaginary
    planes into a single contiguous (2N, D) float32 array."""
    big_n = 2 ** num_qubit
    d = big_n * big_n
    assert U.shape == (d, d)
    rows = U[:, jnp.arange(big_n) * big_n].T            # (N, D): row i = U^T[i*N, :]
    return jnp.concatenate(
        [jnp.real(rows), jnp.imag(rows)], axis=0).astype(jnp.float32)


# ---------------------- deterministic "circuit" unitary ---------------------

def _single_qubit_unitary(key):
    th = jax.random.uniform(key, (3,), minval=0.0, maxval=2.0 * jnp.pi)
    a, b, c = th[0], th[1], th[2]
    ca, sa = jnp.cos(c), jnp.sin(c)
    u = jnp.stack([
        jnp.stack([jnp.exp(1j * a) * ca, jnp.exp(1j * b) * sa]),
        jnp.stack([-jnp.exp(-1j * b) * sa, jnp.exp(-1j * a) * ca]),
    ]).astype(jnp.complex64)
    return u


def make_circuit_unitary(key, total_qubits, num_layers=2):
    """Deterministic synthetic 'Grover query circuit' unitary on 2n qubits:
    alternating layers of random single-qubit rotations and diagonal phases."""
    D = 2 ** total_qubits
    U = jnp.eye(D, dtype=jnp.complex64)
    for _ in range(num_layers):
        key, k_phase = jax.random.split(key)
        layer = jnp.array([[1.0]], dtype=jnp.complex64)
        for _ in range(total_qubits):
            key, kq = jax.random.split(key)
            layer = jnp.kron(layer, _single_qubit_unitary(kq))
        phases = jnp.exp(1j * jax.random.uniform(
            k_phase, (D,), minval=0.0, maxval=2.0 * jnp.pi)).astype(jnp.complex64)
        U = (phases[:, None] * layer) @ U
    return U


# --------------------------------- main -------------------------------------

if __name__ == "__main__":
    num_qubit = 4                         # small, like the PyTorch module's circuit
    N = 2 ** num_qubit                    # 16
    D = N * N                             # 256 = dim of the 2n-qubit state

    key = jax.random.PRNGKey(0)
    U = make_circuit_unitary(key, 2 * num_qubit)          # (D, D) complex64

    # One-time layout prep: gather + pack the only rows the forward needs.
    packed = pack_circuit_rows(U, num_qubit)               # (2N, D) float32

    # Shipped single-step path.
    loss, err, y = grover_query_forward(packed, num_qubit=num_qubit)
    jax.block_until_ready((loss, err, y))

    # Also exercise the lane-tiled (multi-step, "parallel") path at this size.
    loss2, err2, y2 = grover_query_forward(packed, num_qubit=num_qubit,
                                           lane_tile=128)
    jax.block_until_ready((loss2, err2, y2))

    # Pure-JAX reference (complex64).
    psi0 = jnp.zeros((N, N), dtype=jnp.complex64).at[:, 0].set(1.0).reshape(-1)
    y_full = U @ psi0
    diag = jnp.diagonal(y_full.reshape(N, N))
    prob_sum_ref = jnp.real(jnp.vdot(diag, diag))
    loss_ref = 1.0 - prob_sum_ref / N
    err_ref = 1.0 - jnp.min(jnp.abs(diag)) ** 2

    assert jnp.allclose(loss, loss_ref, atol=1e-3), (loss, loss_ref)
    assert jnp.allclose(err, err_ref, atol=1e-3), (err, err_ref)
    assert jnp.allclose(y[0] + 1j * y[1], y_full, atol=1e-3)
    assert jnp.allclose(loss2, loss_ref, atol=1e-3), (loss2, loss_ref)
    assert jnp.allclose(err2, err_ref, atol=1e-3), (err2, err_ref)
    assert jnp.allclose(y2[0] + 1j * y2[1], y_full, atol=1e-3)

    print("KERNEL_OK")
</pallas_src>

<mosaic_0001>
module attributes {stable_mosaic.version = 11 : i64} {
  func.func @_grover_single_step_kernel(%arg0: memref<32x256xf32, #tpu.memory_space<vmem>>, %arg1: memref<2x256xf32, #tpu.memory_space<vmem>>, %arg2: memref<1x1xf32, #tpu.memory_space<vmem>>, %arg3: memref<1x1xf32, #tpu.memory_space<vmem>>) attributes {dimension_semantics = [], scalar_prefetch = 0 : i64, scratch_operands = 0 : i64, tpu.core_type = #tpu.core_type<tc>} {
    %c0 = arith.constant 0 : index
    %c0_0 = arith.constant 0 : index
    %0 = vector.load %arg0[%c0, %c0_0] : memref<32x256xf32, #tpu.memory_space<vmem>>, vector<16x256xf32>
    %cst = arith.constant dense<0.000000e+00> : vector<256xf32>
    %1 = vector.multi_reduction <add>, %0, %cst [0] : vector<16x256xf32> to vector<256xf32>
    %2 = vector.shape_cast %1 : vector<256xf32> to vector<1x256xf32>
    %c16 = arith.constant 16 : index
    %c0_1 = arith.constant 0 : index
    %3 = vector.load %arg0[%c16, %c0_1] : memref<32x256xf32, #tpu.memory_space<vmem>>, vector<16x256xf32>
    %cst_2 = arith.constant dense<0.000000e+00> : vector<256xf32>
    %4 = vector.multi_reduction <add>, %3, %cst_2 [0] : vector<16x256xf32> to vector<256xf32>
    %5 = vector.shape_cast %4 : vector<256xf32> to vector<1x256xf32>
    %c0_3 = arith.constant 0 : index
    %c0_4 = arith.constant 0 : index
    %6 = vector.load %arg1[%c0_3, %c0_4] : memref<2x256xf32, #tpu.memory_space<vmem>>, vector<1x256xf32>
    tpu.vector_store %arg1[%c0_3, %c0_4], %2 {strides = array<i32>} : memref<2x256xf32, #tpu.memory_space<vmem>>, vector<1x256xf32>,
    %c1 = arith.constant 1 : index
    %c0_5 = arith.constant 0 : index
    %7 = vector.load %arg1[%c1, %c0_5] : memref<2x256xf32, #tpu.memory_space<vmem>>, vector<1x256xf32>
    tpu.vector_store %arg1[%c1, %c0_5], %5 {strides = array<i32>} : memref<2x256xf32, #tpu.memory_space<vmem>>, vector<1x256xf32>,
    %8 = tpu.iota {dimensions = array<i32: 1>} : vector<1x256xi32>
    %c4_i32 = arith.constant 4 : i32
    %9 = vector.broadcast %c4_i32 : i32 to vector<1x256xi32>
    %10 = arith.shrsi %8, %9 : vector<1x256xi32>
    %c15_i32 = arith.constant 15 : i32
    %11 = vector.broadcast %c15_i32 : i32 to vector<1x256xi32>
    %12 = arith.andi %8, %11 : vector<1x256xi32>
    %13 = arith.cmpi eq, %10, %12 : vector<1x256xi32>
    %14 = arith.mulf %2, %2 : vector<1x256xf32>
    %15 = arith.mulf %5, %5 : vector<1x256xf32>
    %16 = arith.addf %14, %15 : vector<1x256xf32>
    %cst_6 = arith.constant 0.000000e+00 : f32
    %17 = vector.broadcast %cst_6 : f32 to vector<1x256xf32>
    %18 = arith.select %13, %16, %17 : vector<1x256xi1>, vector<1x256xf32>
    %cst_7 = arith.constant dense<0.000000e+00> : vector<1xf32>
    %19 = vector.multi_reduction <add>, %18, %cst_7 [1] : vector<1x256xf32> to vector<1xf32>
    %20 = vector.shape_cast %19 : vector<1xf32> to vector<1x1xf32>
    %cst_8 = arith.constant 0x7F800000 : f32
    %21 = vector.broadcast %cst_8 : f32 to vector<1x256xf32>
    %22 = arith.select %13, %16, %21 : vector<1x256xi1>, vector<1x256xf32>
    %cst_9 = arith.constant dense<0x7F800000> : vector<1xf32>
    %23 = vector.multi_reduction <minimumf>, %22, %cst_9 [1] : vector<1x256xf32> to vector<1xf32>
    %24 = vector.shape_cast %23 : vector<1xf32> to vector<1x1xf32>
    %cst_10 = arith.constant 6.250000e-02 : f32
    %25 = vector.broadcast %cst_10 : f32 to vector<1x1xf32>
    %26 = arith.mulf %20, %25 : vector<1x1xf32>
    %cst_11 = arith.constant 1.000000e+00 : f32
    %27 = vector.broadcast %cst_11 : f32 to vector<1x1xf32>
    %28 = arith.subf %27, %26 : vector<1x1xf32>
    %c0_12 = arith.constant 0 : index
    %c0_13 = arith.constant 0 : index
    %29 = vector.load %arg2[%c0_12, %c0_13] : memref<1x1xf32, #tpu.memory_space<vmem>>, vector<1x1xf32>
    tpu.vector_store %arg2[%c0_12, %c0_13], %28 {strides = array<i32>} : memref<1x1xf32, #tpu.memory_space<vmem>>, vector<1x1xf32>,
    %cst_14 = arith.constant 1.000000e+00 : f32
    %30 = vector.broadcast %cst_14 : f32 to vector<1x1xf32>
    %31 = arith.subf %30, %24 : vector<1x1xf32>
    %c0_15 = arith.constant 0 : index
    %c0_16 = arith.constant 0 : index
    %32 = vector.load %arg3[%c0_15, %c0_16] : memref<1x1xf32, #tpu.memory_space<vmem>>, vector<1x1xf32>
    tpu.vector_store %arg3[%c0_15, %c0_16], %31 {strides = array<i32>} : memref<1x1xf32, #tpu.memory_space<vmem>>, vector<1x1xf32>,
    return
  }
}

</mosaic_0001>

<bundles_post_ra>
// kernel: grover_query_forward.1
= control target key start
LH: loop header
LB: loop body
LE: loop exit
PB: predicated region body
PF: predicated region fallthrough
CT: control target
= control target key end

     0   :  { %9 = vsyncpa [#allocation3], 0  ;;  %s308_s0 = inlined_call_operand.hbm [shape: f32[32,256], index: 0, kind: input, shape index: {}]   ;;  %s309_s1 = inlined_call_operand.hbm [shape: f32[2,256], index: 1, kind: output, shape index: {0}]   ;;  %s310_s2 = inlined_call_operand.hbm [shape: f32[1,1], index: 2, kind: output, shape index: {1}]   ;;  %s311_s3 = inlined_call_operand.hbm [shape: f32[1,1], index: 3, kind: output, shape index: {2}]  }
   0x1   :  { %10 = vsyncpa [#allocation4], 0 }
   0x2   :  { %11 = vsyncpa [#allocation7], 0  ;;  %s16_s14 = sshll.u32 %s308_s0, 4  ;;  %s270_s15 = smov [#allocation2]   ;;  %s17_s14 = int_to_ptr.hbm [resolvable:$true] %s16_s14 }
   0x3   :  { %s18_s16 = sshll.u32 %s270_s15, 4  ;;  %s271_s17 = smov 256   ;;  %s19_s16 = int_to_ptr.vmem [resolvable:$true] %s18_s16 }
   0x4   :  { %s272_s18 = smov 16  }
   0x5   :  { %24 = dma.hbm_to_vmem [thread:$0]  %s17_s14, 1024, %s19_s16, [#allocation3], %s271_s17, %s271_s17, %s272_s18  }
   0x6   :  { %264 = dma.done.wait [#allocation3], 1024  }
   0x7   :  { %265 = vsyncadd [#allocation3], 4294966272  ;;  %v29_v0 = vld [vmem:[#allocation2] sm:$0xff]  ;;  %v30_v1 = vld [vmem:[#allocation2 + $0x8] sm:$0xff]  ;;  %v71_v10 = vlaneseq  ;;  %s273_s0 = smov [#allocation5]   ;;  %s121_s22 = sshll.u32 %s309_s1, 4  ;;  %s122_s22 = int_to_ptr.hbm [resolvable:$true] %s121_s22 }
   0x8   :  { %v31_v2 = vld [vmem:[#allocation2 + $0x10] sm:$0xff]  ;;  %v32_v3 = vld [vmem:[#allocation2 + $0x18] sm:$0xff]  ;;  %v47_v5 = vld [vmem:[#allocation2 + $0x20] sm:$0xff]  ;;  %s119_s19 = sshll.u32 %s273_s0, 4  ;;  %vm68_vm2 = vcmask 1040384   ;;  %s274_s23 = smov [#allocation6]   ;;  %s120_s19 = int_to_ptr.vmem [resolvable:$true] %s119_s19 }
   0x9   :  { %v33_v4 = vadd.f32 %v31_v2, %v29_v0  ;;  %v48_v6 = vld [vmem:[#allocation2 + $0x28] sm:$0xff]  ;;  %v40_v7 = vadd.f32 %v32_v3, %v30_v1  ;;  %v49_v8 = vld [vmem:[#allocation2 + $0x30] sm:$0xff]  ;;  %v50_v9 = vld [vmem:[#allocation2 + $0x38] sm:$0xff]  ;;  %v84_v19 = vand.u32 127, %v71_v10  ;;  %vm73_vm3 = vcmp.lt.s32.totalorder %v71_v10, 256  ;;  %s130_s24 = sshll.u32 %s274_s23, 4  ;;  %s131_s24 = int_to_ptr.vmem [resolvable:$true] %s130_s24 }
   0xa   :  { %v51_v12 = vadd.f32 %v49_v8, %v47_v5  ;;  %v58_v13 = vadd.f32 %v50_v9, %v48_v6  ;;  %s132_s27 = sshll.u32 %s310_s2, 4  ;;  %vm110_vm4 = vcmask 0   ;;  %s275_s1 = smov [#allocation8]   ;;  %s133_s27 = int_to_ptr.hbm [resolvable:$true] %s132_s27 }
   0xb   :  { %v34_v11 = vrot.slane %v33_v4, 4  ;;  %v41_v14 = vrot.slane %v40_v7, 4  ;;  %v85_v28 = vadd.s32 128, %v84_v19  ;;  %v86_v36 = vshra.s32 %v84_v19, 4  ;;  %s141_s28 = sshll.u32 %s275_s1, 4  ;;  %s143_s4 = sshll.u32 %s311_s3, 4  ;;  %s142_s28 = int_to_ptr.vmem [resolvable:$true] %s141_s28  ;;  %s144_s4 = int_to_ptr.hbm [resolvable:$true] %s143_s4 }
   0xc   :  { %v52_v16 = vrot.slane %v51_v12, 4  ;;  %v59_v17 = vrot.slane %v58_v13, 4  ;;  %v88_v39 = vand.u32 15, %v84_v19 }
   0xd   :  { %v35_v15 = vadd.f32 %v34_v11, %v33_v4  ;;  %v42_v18 = vadd.f32 %v41_v14, %v40_v7  ;;  %v87_v38 = vshra.s32 %v85_v28, 4  ;;  %v89_v40 = vand.u32 15, %v85_v28 }
   0xe   :  { %v53_v21 = vadd.f32 %v52_v16, %v51_v12  ;;  %v60_v22 = vadd.f32 %v59_v17, %v58_v13  ;;  %vm90_vm0 = vcmp.eq.s32.totalorder %v86_v36, %v88_v39 }
   0xf   :  { %v36_v20 = vrot.slane %v35_v15, 2  ;;  %v43_v23 = vrot.slane %v42_v18, 2  ;;  %vm91_vm1 = vcmp.eq.s32.totalorder %v87_v38, %v89_v40 }
  0x10   :  { %v54_v25 = vrot.slane %v53_v21, 2  ;;  %v61_v26 = vrot.slane %v60_v22, 2 }
  0x11   :  { %v37_v24 = vadd.f32 %v36_v20, %v35_v15  ;;  %v44_v27 = vadd.f32 %v43_v23, %v42_v18 }
  0x12   :  { %v55_v30 = vadd.f32 %v54_v25, %v53_v21  ;;  %v62_v31 = vadd.f32 %v61_v26, %v60_v22 }
  0x13   :  { %v38_v29 = vrot.slane %v37_v24, 1  ;;  %v45_v32 = vrot.slane %v44_v27, 1 }
  0x14   :  { %v56_v34 = vrot.slane %v55_v30, 1  ;;  %v63_v35 = vrot.slane %v62_v31, 1 }
  0x15   :  { %v39_v33 = vadd.f32 %v38_v29, %v37_v24  ;;  %v46_v37 = vadd.f32 %v45_v32, %v44_v27 }
  0x16   :  { %v57_v41 = vadd.f32 %v56_v34, %v55_v30  ;;  %v64_v42 = vadd.f32 %v63_v35, %v62_v31 }
  0x17   :  { %v92_v43 = vmul.f32 %v39_v33, %v39_v33  ;;  %v93_v44 = vmul.f32 %v46_v37, %v46_v37  ;;  %v67_v55 = vrot.slane %v46_v37, 7 }
  0x18   :  { %v94_v45 = vmul.f32 %v57_v41, %v57_v41  ;;  %v95_v46 = vmul.f32 %v64_v42, %v64_v42  ;;  %v78_v56 = vrot.slane %v64_v42, 7 }
  0x19   :  { %v69_v57 = vsel %vm68_vm2, %v39_v33, %v67_v55 }
  0x1a   :  { %v96_v47 = vadd.f32 %v94_v45, %v92_v43  ;;  %v97_v48 = vadd.f32 %v95_v46, %v93_v44  ;;  %v79_v58 = vsel %vm68_vm2, %v57_v41, %v78_v56  ;;  %75 = vst.msk [vmem:[#allocation5] ss:$2 sm:$0x3] %vm73_vm3, %v69_v57 }
  0x1b   :  { %82 = vst.msk [vmem:[#allocation5 + $0x1] ss:$2 sm:$0x3] %vm73_vm3, %v79_v58 }
  0x1c   :  { %v98_v49 = vsel %vm90_vm0, %v96_v47, 0.0  ;;  %v99_v50 = vsel %vm91_vm1, %v97_v48, 0.0  ;;  %v103_v52 = vsel %vm90_vm0, %v96_v47, inf  ;;  %v104_v53 = vsel %vm91_vm1, %v97_v48, inf  ;;  %124 = dma.vmem_to_hbm [thread:$0]  %s120_s19, 64, %s122_s22, [#allocation4]  }
  0x1d   :  { %v100_v51 = vadd.f32 %v99_v50, %v98_v49  ;;  %v105_v54 = vmin.f32 %v103_v52, %v104_v53 }
  0x1f   :  { %101 = vadd.xlane.f32.xlu0 %v100_v51 }
  0x27   :  { %106 = vmin.xlane.f32.xlu0 %v105_v54 }
  0x92   :  { %v102_v59 = vpop.xlane.xlu0 %101 }
  0x93   :  { %v108_v60 = vmul.f32 0.0625, %v102_v59 }
  0x95   :  { %v109_v61 = vsub.f32 1.0, %v108_v60 }
  0x97   :  { %111 = vst.msk [vmem:[#allocation6] sm:$0x1] %vm110_vm4, %v109_v61 }
  0x98   :  { %135 = dma.vmem_to_hbm [thread:$0]  %s131_s24, 16, %s133_s27, [#allocation7]  }
  0x9a   :  { %v107_v62 = vpop.xlane.xlu0 %106 }
  0x9b   :  { %v112_v63 = vsub.f32 1.0, %v107_v62 }
  0x9d   :  { %113 = vst.msk [vmem:[#allocation8] sm:$0x1] %vm110_vm4, %v112_v63 }
  0x9e   :  { %146 = dma.vmem_to_hbm [thread:$0]  %s142_s28, 16, %s144_s4, [#allocation7]  }
  0x9f   :  { %266 = dma.done.wait [#allocation4], 64  }
  0xa0   :  { %267 = vsyncadd [#allocation4], 4294967232 }
  0xa1   :  { %268 = dma.done.wait [#allocation7], 32  }
  0xa2   :  { %269 = vsyncadd [#allocation7], 4294967264 }
  0xa3   :  { %159 = vsyncpa [#allocation3], 1 }
  0xa4   :  { %160 = vsyncpa [#allocation4], 1 }
  0xa5   :  { %161 = vsyncpa [#allocation7], 1 }

</bundles_post_ra>
